<compile_context>
chip_gen: v5e
topology: v5e:2x2
jax: 0.10.0
libtpu: 0.0.40
codegen_flags: <defaults>
</compile_context>

<pallas_src>
import numpy as np

import jax
import jax.numpy as jnp
from jax.experimental import pallas as pl
from jax.experimental.pallas import tpu as pltpu

_BN_EPS = 1e-5


def _round_up(x, m):
    return ((x + m - 1) // m) * m


# ----------------------------------------------------------------------------
# Trace-time constant "structure" tensors (pure numpy -> baked into composites)
# ----------------------------------------------------------------------------
def _conv_structure(hi, wi, k=3, stride=2, pad=1):
    """S[t, iy*Wi+ix, oy*Wo+ox] = 1 where tap t of output (oy,ox) reads input (iy,ix);
    missing (zero) rows implement the zero padding."""
    ho = (hi + 2 * pad - k) // stride + 1
    wo = (wi + 2 * pad - k) // stride + 1
    s = np.zeros((k * k, hi * wi, ho * wo), np.float32)
    for ky in range(k):
        for kx in range(k):
            t = ky * k + kx
            for oy in range(ho):
                for ox in range(wo):
                    iy = stride * oy + ky - pad
                    ix = stride * ox + kx - pad
                    if 0 <= iy < hi and 0 <= ix < wi:
                        s[t, iy * wi + ix, oy * wo + ox] = 1.0
    return s, ho, wo


def _pool_structure(hi, wi, k=2, stride=2):
    """P[iy*Wi+ix, oy*Wo+ox] = 1/(k*k): AvgPool2d(k, stride) as a matrix."""
    ho = (hi - k) // stride + 1
    wo = (wi - k) // stride + 1
    p = np.zeros((hi * wi, ho * wo), np.float32)
    for oy in range(ho):
        for ox in range(wo):
            for dy in range(k):
                for dx in range(k):
                    p[(stride * oy + dy) * wi + (stride * ox + dx),
                      oy * wo + ox] = 1.0 / (k * k)
    return p, ho, wo


def _fold_conv_bn(w_pt, bias, gamma, beta, rmean, rvar, eps=_BN_EPS):
    """Fold eval-mode BatchNorm into the conv weights.
    Returns tap-major weights (k*k, cin, cout) and per-channel shift (cout,)."""
    cout, cin, kh, kw = w_pt.shape
    scale = gamma / jnp.sqrt(rvar + eps)
    shift = (bias - rmean) * scale + beta
    w = jnp.transpose(w_pt, (2, 3, 1, 0)) * scale[None, None, None, :]   # (kh,kw,cin,cout)
    return w.reshape(kh * kw, cin, cout).astype(jnp.float32), shift.astype(jnp.float32)


# ----------------------------------------------------------------------------
# The single fused Pallas kernel: three chained lane-dense matmuls per batch tile
# ----------------------------------------------------------------------------
def _fused_forward_kernel(x_ref, w1_ref, b1_ref, w2_ref, b2_ref, w3_ref, b3_ref, o_ref):
    x = x_ref[...]                                                        # (TB, H*W) bf16
    # im2col + conv1 + BN scale (composite) -> + shift -> ReLU
    a1 = jnp.dot(x, w1_ref[...], preferred_element_type=jnp.float32)     # (TB, 512) f32
    a1 = jnp.maximum(a1 + b1_ref[...], 0.0)
    # AvgPool1 + conv2 patch gather + conv2 + BN scale (composite) -> + shift -> ReLU
    a2 = jnp.dot(a1.astype(w2_ref.dtype), w2_ref[...],
                 preferred_element_type=jnp.float32)                     # (TB, 128) f32
    a2 = jnp.maximum(a2 + b2_ref[...], 0.0)
    # AvgPool2 + flatten + Linear (composite, padded to 128 output lanes)
    out = jnp.dot(a2.astype(w3_ref.dtype), w3_ref[...],
                  preferred_element_type=jnp.float32)                    # (TB, 128) f32
    o_ref[...] = (out + b3_ref[...]).astype(o_ref.dtype)


def _fused_forward(x_flat, w1, b1, w2, b2, w3, b3, block_b):
    n, d_in = x_flat.shape
    n_pad = pl.cdiv(n, block_b) * block_b
    if n_pad != n:
        x_flat = jnp.pad(x_flat, ((0, n_pad - n), (0, 0)))
    d_out = w3.shape[1]

    def fixed(arr):
        return pl.BlockSpec(arr.shape, lambda b: (0, 0))

    out = pl.pallas_call(
        _fused_forward_kernel,
        out_shape=jax.ShapeDtypeStruct((n_pad, d_out), jnp.float32),
        grid=(n_pad // block_b,),
        in_specs=[
            pl.BlockSpec((block_b, d_in), lambda b: (b, 0)),   # streaming input tiles
            fixed(w1), fixed(b1),                              # resident composites
            fixed(w2), fixed(b2),
            fixed(w3), fixed(b3),
        ],
        out_specs=pl.BlockSpec((block_b, d_out), lambda b: (b, 0)),
        compiler_params=pltpu.CompilerParams(
            dimension_semantics=("parallel",)),
    )(x_flat, w1, b1, w2, b2, w3, b3)
    return out[:n]


# ----------------------------------------------------------------------------
# Full model forward
# ----------------------------------------------------------------------------
@jax.jit
def music_cnn2d_2block_forward(x_nchw, conv1_p, conv2_p, fc_w, fc_b):
    n, c, h, w = x_nchw.shape
    assert c == 1

    # Fold eval-mode BatchNorm into conv weights / per-channel shifts.
    w1f, b1s = _fold_conv_bn(*conv1_p)            # (9, 1, C1), (C1,)
    w2f, b2s = _fold_conv_bn(*conv2_p)            # (9, C1, C2), (C2,)
    c1, c2 = w1f.shape[2], w2f.shape[2]

    # Static spatial structure of the whole network (trace-time numpy).
    s1, ho1, wo1 = _conv_structure(h, w)          # conv1: (9, H*W, Ho1*Wo1)
    p1, hp1, wp1 = _pool_structure(ho1, wo1)      # pool1: (Ho1*Wo1, Hp1*Wp1)
    s2, ho2, wo2 = _conv_structure(hp1, wp1)      # conv2: (9, Hp1*Wp1, Ho2*Wo2)
    p2, hq2, wq2 = _pool_structure(ho2, wo2)      # pool2: (Ho2*Wo2, Hq2*Wq2)
    q2 = hq2 * wq2
    assert fc_w.shape[0] == c2 * q2, "DNN_input_dim must equal flattened conv2 output"

    # Stage-1 composite: im2col + conv1 (+ folded BN scale).  Output rows laid out
    # position-major / channel-minor: column = pos*C1 + chan.
    w1c = jnp.einsum('tqp,tc->qpc', s1, w1f[:, 0, :]).reshape(h * w, ho1 * wo1 * c1)
    b1c = jnp.tile(b1s.reshape(1, c1), (1, ho1 * wo1))                   # (1, 512)

    # Stage-2 composite: AvgPool1 + stride-2/pad-1 patch gather + conv2 weights.
    t2 = np.einsum('pq,tqr->tpr', p1, s2)                                # (9, 64, 4)
    w2c = jnp.einsum('tpr,tcd->pcrd', t2, w2f).reshape(ho1 * wo1 * c1,
                                                       ho2 * wo2 * c2)   # (512, 128)
    b2c = jnp.tile(b2s.reshape(1, c2), (1, ho2 * wo2))                   # (1, 128)

    # Stage-3 composite: AvgPool2 + NCHW flatten + final Linear, padded to 128 lanes.
    nout = fc_w.shape[1]
    w3c = jnp.einsum('pq,cqo->pco', p2,
                     fc_w.reshape(c2, q2, nout)).reshape(ho2 * wo2 * c2, nout)
    nout_pad = _round_up(max(nout, 128), 128)
    w3c = jnp.pad(w3c, ((0, 0), (0, nout_pad - nout)))                   # (128, 128)
    b3c = jnp.pad(fc_b.reshape(1, nout), ((0, 0), (0, nout_pad - nout)))

    # bf16 for the streaming input + resident matmul weights (halves HBM/VMEM bytes);
    # accumulation, bias-add and ReLU remain f32.
    x_flat = x_nchw.reshape(n, h * w).astype(jnp.bfloat16)
    w1c, w2c, w3c = (m.astype(jnp.bfloat16) for m in (w1c, w2c, w3c))
    b1c, b2c, b3c = (m.astype(jnp.float32) for m in (b1c, b2c, b3c))

    # Batch tile: large enough to amortize ~0.35us/step, multiple of 8 (sublane), keeps
    # several grid steps for megacore sharding and stays well inside v7x scoped VMEM.
    tb = min(512, _round_up(n, 8))
    out = _fused_forward(x_flat, w1c, b1c, w2c, b2c, w3c, b3c, tb)
    return out[:, :nout]


# ----------------------------------------------------------------------------
# Pure-JAX reference (for a correctness self-check) and parameter init
# ----------------------------------------------------------------------------
def _reference_forward(x_nchw, conv1_p, conv2_p, fc_w, fc_b):
    def block(x, p):
        w, b, gamma, beta, rmean, rvar = p
        y = jax.lax.conv_general_dilated(x, w, (2, 2), ((1, 1), (1, 1)),
                                         dimension_numbers=("NCHW", "OIHW", "NCHW"))
        y = y + b[None, :, None, None]
        scale = gamma / jnp.sqrt(rvar + _BN_EPS)
        y = (y - rmean[None, :, None, None]) * scale[None, :, None, None] \
            + beta[None, :, None, None]
        y = jnp.maximum(y, 0.0)
        nb, nc, hh, ww = y.shape
        return y.reshape(nb, nc, hh // 2, 2, ww // 2, 2).mean(axis=(3, 5))

    y = block(x_nchw, conv1_p)
    y = block(y, conv2_p)
    y = y.reshape(y.shape[0], -1)
    return y @ fc_w + fc_b


def init_params(key, c1=8, c2=32, dnn_in=32, dnn_out=10):
    ks = jax.random.split(key, 12)

    def conv_params(kw, kb, kg, kbeta, km, kv, cin, cout):
        w = jax.random.normal(kw, (cout, cin, 3, 3), jnp.float32) * 0.1
        b = jax.random.normal(kb, (cout,), jnp.float32) * 0.05
        gamma = jax.random.uniform(kg, (cout,), jnp.float32, 0.5, 1.5)
        beta = jax.random.normal(kbeta, (cout,), jnp.float32) * 0.05
        rmean = jax.random.normal(km, (cout,), jnp.float32) * 0.05
        rvar = jax.random.uniform(kv, (cout,), jnp.float32, 0.5, 1.5)
        return (w, b, gamma, beta, rmean, rvar)

    conv1_p = conv_params(*ks[0:6], cin=1, cout=c1)
    conv2_p = conv_params(*ks[6:12], cin=c1, cout=c2)

    kfw, kfb = jax.random.split(jax.random.fold_in(key, 99))
    # NOTE: stored (in, out); transpose when importing a PyTorch nn.Linear state_dict.
    fc_w = jax.random.normal(kfw, (dnn_in, dnn_out), jnp.float32) * 0.1
    fc_b = jax.random.normal(kfb, (dnn_out,), jnp.float32) * 0.05
    return conv1_p, conv2_p, fc_w, fc_b


if __name__ == "__main__":
    key = jax.random.PRNGKey(0)
    kx, kp = jax.random.split(key)

    # x: (N=2, C=1, H=16, W=16) -> conv1: 8x8x8 -> pool: 4x4x8
    #                           -> conv2: 2x2x32 -> pool: 1x1x32 -> flatten 32 -> FC 10
    x = jax.random.normal(kx, (2, 1, 16, 16), jnp.float32)
    conv1_p, conv2_p, fc_w, fc_b = init_params(kp, c1=8, c2=32, dnn_in=32, dnn_out=10)

    out = music_cnn2d_2block_forward(x, conv1_p, conv2_p, fc_w, fc_b)
    out = jax.block_until_ready(out)
    assert out.shape == (2, 10), out.shape
    assert bool(jnp.all(jnp.isfinite(out)))

    ref = _reference_forward(x, conv1_p, conv2_p, fc_w, fc_b)
    assert float(jnp.max(jnp.abs(out - ref))) < 0.1, "mismatch vs pure-JAX reference"
    print("KERNEL_OK")
</pallas_src>

<mosaic_0001>
module attributes {stable_mosaic.version = 11 : i64} {
  func.func @_fused_forward_kernel(%arg0: i32, %arg1: memref<8x256xbf16, #tpu.memory_space<vmem>>, %arg2: memref<256x512xbf16, #tpu.memory_space<vmem>>, %arg3: memref<1x512xf32, #tpu.memory_space<vmem>>, %arg4: memref<512x128xbf16, #tpu.memory_space<vmem>>, %arg5: memref<1x128xf32, #tpu.memory_space<vmem>>, %arg6: memref<128x128xbf16, #tpu.memory_space<vmem>>, %arg7: memref<1x128xf32, #tpu.memory_space<vmem>>, %arg8: memref<8x128xf32, #tpu.memory_space<vmem>>) attributes {dimension_semantics = [#tpu.dimension_semantics<parallel>], iteration_bounds = array<i64: 1>, scalar_prefetch = 0 : i64, scratch_operands = 0 : i64, tpu.core_type = #tpu.core_type<tc>, window_params = [{transform_indices = @transform_0, window_bounds = array<i64: 8, 256>}, {pipeline_mode = #tpu.pipeline_mode<synchronous>, transform_indices = @transform_1, window_bounds = array<i64: 256, 512>}, {pipeline_mode = #tpu.pipeline_mode<synchronous>, transform_indices = @transform_2, window_bounds = array<i64: 1, 512>}, {pipeline_mode = #tpu.pipeline_mode<synchronous>, transform_indices = @transform_3, window_bounds = array<i64: 512, 128>}, {pipeline_mode = #tpu.pipeline_mode<synchronous>, transform_indices = @transform_4, window_bounds = array<i64: 1, 128>}, {pipeline_mode = #tpu.pipeline_mode<synchronous>, transform_indices = @transform_5, window_bounds = array<i64: 128, 128>}, {pipeline_mode = #tpu.pipeline_mode<synchronous>, transform_indices = @transform_6, window_bounds = array<i64: 1, 128>}, {transform_indices = @transform_7, window_bounds = array<i64: 8, 128>}]} {
    %c0 = arith.constant 0 : index
    %c0_0 = arith.constant 0 : index
    %0 = vector.load %arg1[%c0, %c0_0] : memref<8x256xbf16, #tpu.memory_space<vmem>>, vector<8x256xbf16>
    %c0_1 = arith.constant 0 : index
    %c0_2 = arith.constant 0 : index
    %1 = vector.load %arg2[%c0_1, %c0_2] : memref<256x512xbf16, #tpu.memory_space<vmem>>, vector<256x512xbf16>
    %cst = arith.constant dense<0.000000e+00> : vector<8x512xf32>
    %2 = tpu.matmul %0, %1, %cst {dimension_numbers = #tpu.dot_dimension_numbers<[1], [0], [0], [1], [0, 0, 1, 1], [], []>} : vector<8x256xbf16>, vector<256x512xbf16>, vector<8x512xf32> -> vector<8x512xf32>
    %c0_3 = arith.constant 0 : index
    %c0_4 = arith.constant 0 : index
    %3 = vector.load %arg3[%c0_3, %c0_4] : memref<1x512xf32, #tpu.memory_space<vmem>>, vector<1x512xf32>
    %4 = vector.broadcast %3 : vector<1x512xf32> to vector<8x512xf32>
    %5 = arith.addf %2, %4 : vector<8x512xf32>
    %cst_5 = arith.constant 0.000000e+00 : f32
    %6 = vector.broadcast %cst_5 : f32 to vector<8x512xf32>
    %7 = arith.maximumf %5, %6 : vector<8x512xf32>
    %8 = arith.truncf %7 : vector<8x512xf32> to vector<8x512xbf16>
    %c0_6 = arith.constant 0 : index
    %c0_7 = arith.constant 0 : index
    %9 = vector.load %arg4[%c0_6, %c0_7] : memref<512x128xbf16, #tpu.memory_space<vmem>>, vector<512x128xbf16>
    %cst_8 = arith.constant dense<0.000000e+00> : vector<8x128xf32>
    %10 = tpu.matmul %8, %9, %cst_8 {dimension_numbers = #tpu.dot_dimension_numbers<[1], [0], [0], [1], [0, 0, 1, 1], [], []>} : vector<8x512xbf16>, vector<512x128xbf16>, vector<8x128xf32> -> vector<8x128xf32>
    %c0_9 = arith.constant 0 : index
    %c0_10 = arith.constant 0 : index
    %11 = vector.load %arg5[%c0_9, %c0_10] : memref<1x128xf32, #tpu.memory_space<vmem>>, vector<1x128xf32>
    %12 = vector.broadcast %11 : vector<1x128xf32> to vector<8x128xf32>
    %13 = arith.addf %10, %12 : vector<8x128xf32>
    %cst_11 = arith.constant 0.000000e+00 : f32
    %14 = vector.broadcast %cst_11 : f32 to vector<8x128xf32>
    %15 = arith.maximumf %13, %14 : vector<8x128xf32>
    %16 = arith.truncf %15 : vector<8x128xf32> to vector<8x128xbf16>
    %c0_12 = arith.constant 0 : index
    %c0_13 = arith.constant 0 : index
    %17 = vector.load %arg6[%c0_12, %c0_13] : memref<128x128xbf16, #tpu.memory_space<vmem>>, vector<128x128xbf16>
    %cst_14 = arith.constant dense<0.000000e+00> : vector<8x128xf32>
    %18 = tpu.matmul %16, %17, %cst_14 {dimension_numbers = #tpu.dot_dimension_numbers<[1], [0], [0], [1], [0, 0, 1, 1], [], []>} : vector<8x128xbf16>, vector<128x128xbf16>, vector<8x128xf32> -> vector<8x128xf32>
    %c0_15 = arith.constant 0 : index
    %c0_16 = arith.constant 0 : index
    %19 = vector.load %arg7[%c0_15, %c0_16] : memref<1x128xf32, #tpu.memory_space<vmem>>, vector<1x128xf32>
    %20 = vector.broadcast %19 : vector<1x128xf32> to vector<8x128xf32>
    %21 = arith.addf %18, %20 : vector<8x128xf32>
    %c0_17 = arith.constant 0 : index
    %c0_18 = arith.constant 0 : index
    %22 = vector.load %arg8[%c0_17, %c0_18] : memref<8x128xf32, #tpu.memory_space<vmem>>, vector<8x128xf32>
    tpu.vector_store %arg8[%c0_17, %c0_18], %21 {strides = array<i32>} : memref<8x128xf32, #tpu.memory_space<vmem>>, vector<8x128xf32>,
    return
  }
  func.func @transform_0(%arg0: i32) -> (i32, i32) {
    %c0_i32 = arith.constant 0 : i32
    %c0_i32_0 = arith.constant 0 : i32
    return %arg0, %c0_i32 : i32, i32
  }
  func.func @transform_1(%arg0: i32) -> (i32, i32) {
    %c0_i32 = arith.constant 0 : i32
    %c0_i32_0 = arith.constant 0 : i32
    %c0_i32_1 = arith.constant 0 : i32
    return %c0_i32, %c0_i32_0 : i32, i32
  }
  func.func @transform_2(%arg0: i32) -> (i32, i32) {
    %c0_i32 = arith.constant 0 : i32
    %c0_i32_0 = arith.constant 0 : i32
    %c0_i32_1 = arith.constant 0 : i32
    return %c0_i32, %c0_i32_0 : i32, i32
  }
  func.func @transform_3(%arg0: i32) -> (i32, i32) {
    %c0_i32 = arith.constant 0 : i32
    %c0_i32_0 = arith.constant 0 : i32
    %c0_i32_1 = arith.constant 0 : i32
    return %c0_i32, %c0_i32_0 : i32, i32
  }
  func.func @transform_4(%arg0: i32) -> (i32, i32) {
    %c0_i32 = arith.constant 0 : i32
    %c0_i32_0 = arith.constant 0 : i32
    %c0_i32_1 = arith.constant 0 : i32
    return %c0_i32, %c0_i32_0 : i32, i32
  }
  func.func @transform_5(%arg0: i32) -> (i32, i32) {
    %c0_i32 = arith.constant 0 : i32
    %c0_i32_0 = arith.constant 0 : i32
    %c0_i32_1 = arith.constant 0 : i32
    return %c0_i32, %c0_i32_0 : i32, i32
  }
  func.func @transform_6(%arg0: i32) -> (i32, i32) {
    %c0_i32 = arith.constant 0 : i32
    %c0_i32_0 = arith.constant 0 : i32
    %c0_i32_1 = arith.constant 0 : i32
    return %c0_i32, %c0_i32_0 : i32, i32
  }
  func.func @transform_7(%arg0: i32) -> (i32, i32) {
    %c0_i32 = arith.constant 0 : i32
    %c0_i32_0 = arith.constant 0 : i32
    return %arg0, %c0_i32 : i32, i32
  }
}

</mosaic_0001>

<bundles_post_ra>
// kernel: music_cnn2d_2block_forward.1
= control target key start
LH: loop header
LB: loop body
LE: loop exit
PB: predicated region body
PF: predicated region fallthrough
CT: control target
= control target key end

     0   :  { %s2033_s1 = inlined_call_operand.vmem [shape: bf16[256,512], index: 1, kind: input, shape index: {}]   ;;  %s2034_s0 = inlined_call_operand.vmem [shape: bf16[8,256], index: 0, kind: input, shape index: {}]   ;;  %s2035_s3 = inlined_call_operand.vmem [shape: bf16[512,128], index: 3, kind: input, shape index: {}]   ;;  %s2036_s4 = inlined_call_operand.vmem [shape: f32[1,128], index: 4, kind: input, shape index: {}]   ;;  %s2037_s2 = inlined_call_operand.vmem [shape: f32[1,512], index: 2, kind: input, shape index: {}]   ;;  %s2038_s6 = inlined_call_operand.vmem [shape: f32[1,128], index: 6, kind: input, shape index: {}]   ;;  %s2039_s5 = inlined_call_operand.vmem [shape: bf16[128,128], index: 5, kind: input, shape index: {}]   ;;  %s2040_s7 = inlined_call_operand.vmem [shape: f32[8,128], index: 7, kind: output, shape index: {}]  }
   0x1   :  { %v1054_v0 = vld [vmem:[%s2033_s1 + $0xe0] sm:$0xf]  ;;  %v1386_v1 = vld [vmem:[%s2033_s1 + $0xec] sm:$0xf0]  ;;  %v1384_v5 = vld [vmem:[%s2033_s1 + $0xe4] sm:$0xf] }
   0x2   :  { %v1182_v2 = vld [vmem:[%s2033_s1 + $0x1e0] sm:$0xf]  ;;  %v1055_v3 = vor.u32 %v1386_v1, %v1054_v0  ;;  %v1418_v4 = vld [vmem:[%s2033_s1 + $0x1ec] sm:$0xf0]  ;;  %v1056_v6 = vld [vmem:[%s2033_s1 + $0xf0] sm:$0xf0] }
   0x3   :  { %v1183_v7 = vor.u32 %v1418_v4, %v1182_v2  ;;  %v1059_v8 = vor.u32 %v1384_v5, %v1056_v6  ;;  %v1416_v9 = vld [vmem:[%s2033_s1 + $0x1e4] sm:$0xf]  ;;  %v1184_v10 = vld [vmem:[%s2033_s1 + $0x1f0] sm:$0xf0]  ;;  %v1038_v11 = vld [vmem:[%s2033_s1 + $0xc0] sm:$0xf] }
   0x4   :  { %428 = vmatpush.bf16.msra.mxu0 %v1055_v3  ;;  %v1187_v12 = vor.u32 %v1416_v9, %v1184_v10  ;;  %v1382_v13 = vld [vmem:[%s2033_s1 + $0xcc] sm:$0xf0]  ;;  %v1166_v14 = vld [vmem:[%s2033_s1 + $0x1c0] sm:$0xf]  ;;  %v1380_v18 = vld [vmem:[%s2033_s1 + $0xc4] sm:$0xf] }
   0x5   :  { %v1414_v15 = vld [vmem:[%s2033_s1 + $0x1cc] sm:$0xf0]  ;;  %441 = vmatpush.bf16.msra.mxu1 %v1183_v7  ;;  %454 = vmatpush.bf16.msra.mxu2 %v1059_v8  ;;  %v1039_v16 = vor.u32 %v1382_v13, %v1038_v11  ;;  %v1040_v19 = vld [vmem:[%s2033_s1 + $0xd0] sm:$0xf0]  ;;  %v1412_v20 = vld [vmem:[%s2033_s1 + $0x1c4] sm:$0xf] }
   0x6   :  { %v1167_v17 = vor.u32 %v1414_v15, %v1166_v14  ;;  %467 = vmatpush.bf16.msra.mxu3 %v1187_v12  ;;  %v1043_v21 = vor.u32 %v1380_v18, %v1040_v19  ;;  %v1168_v22 = vld [vmem:[%s2033_s1 + $0x1d0] sm:$0xf0]  ;;  %v1022_v23 = vld [vmem:[%s2033_s1 + $0xa0] sm:$0xf]  ;;  %v1378_v24 = vld [vmem:[%s2033_s1 + $0xac] sm:$0xf0] }
   0x7   :  { %v1171_v25 = vor.u32 %v1412_v20, %v1168_v22  ;;  %v1150_v26 = vld [vmem:[%s2033_s1 + $0x1a0] sm:$0xf]  ;;  %v1410_v27 = vld [vmem:[%s2033_s1 + $0x1ac] sm:$0xf0]  ;;  %v1376_v28 = vld [vmem:[%s2033_s1 + $0xa4] sm:$0xf]  ;;  %v1023_v29 = vor.u32 %v1378_v24, %v1022_v23 }
   0x8   :  { %429 = vmatpush.bf16.msra.mxu0 %v1039_v16  ;;  %v1024_v30 = vld [vmem:[%s2033_s1 + $0xb0] sm:$0xf0]  ;;  %v1408_v31 = vld [vmem:[%s2033_s1 + $0x1a4] sm:$0xf]  ;;  %v1151_v33 = vor.u32 %v1410_v27, %v1150_v26  ;;  %v1006_v35 = vld [vmem:[%s2033_s1 + $0x80] sm:$0xf] }
   0x9   :  { %v1152_v32 = vld [vmem:[%s2033_s1 + $0x1b0] sm:$0xf0]  ;;  %442 = vmatpush.bf16.msra.mxu1 %v1167_v17  ;;  %455 = vmatpush.bf16.msra.mxu2 %v1043_v21  ;;  %v1027_v34 = vor.u32 %v1376_v28, %v1024_v30  ;;  %v1374_v36 = vld [vmem:[%s2033_s1 + $0x8c] sm:$0xf0]  ;;  %v1134_v37 = vld [vmem:[%s2033_s1 + $0x180] sm:$0xf] }
   0xa   :  { %468 = vmatpush.bf16.msra.mxu3 %v1171_v25  ;;  %v1155_v38 = vor.u32 %v1408_v31, %v1152_v32  ;;  %v1406_v39 = vld [vmem:[%s2033_s1 + $0x18c] sm:$0xf0]  ;;  %v1372_v40 = vld [vmem:[%s2033_s1 + $0x84] sm:$0xf]  ;;  %v1008_v41 = vld [vmem:[%s2033_s1 + $0x90] sm:$0xf0]  ;;  %v1007_v44 = vor.u32 %v1374_v36, %v1006_v35 }
   0xb   :  { %v1404_v42 = vld [vmem:[%s2033_s1 + $0x184] sm:$0xf]  ;;  %v1136_v43 = vld [vmem:[%s2033_s1 + $0x190] sm:$0xf0]  ;;  %v1135_v45 = vor.u32 %v1406_v39, %v1134_v37  ;;  %v1011_v46 = vor.u32 %v1372_v40, %v1008_v41  ;;  %v990_v47 = vld [vmem:[%s2033_s1 + $0x60] sm:$0xf] }
   0xc   :  { %430 = vmatpush.bf16.msra.mxu0 %v1023_v29  ;;  %v1370_v48 = vld [vmem:[%s2033_s1 + $0x6c] sm:$0xf0]  ;;  %v1118_v49 = vld [vmem:[%s2033_s1 + $0x160] sm:$0xf]  ;;  %v1139_v50 = vor.u32 %v1404_v42, %v1136_v43  ;;  %v1368_v52 = vld [vmem:[%s2033_s1 + $0x64] sm:$0xf] }
   0xd   :  { %443 = vmatpush.bf16.msra.mxu1 %v1151_v33  ;;  %456 = vmatpush.bf16.msra.mxu2 %v1027_v34  ;;  %v1402_v51 = vld [vmem:[%s2033_s1 + $0x16c] sm:$0xf0]  ;;  %v992_v53 = vld [vmem:[%s2033_s1 + $0x70] sm:$0xf0]  ;;  %v1400_v54 = vld [vmem:[%s2033_s1 + $0x164] sm:$0xf]  ;;  %v991_v56 = vor.u32 %v1370_v48, %v990_v47 }
   0xe   :  { %469 = vmatpush.bf16.msra.mxu3 %v1155_v38  ;;  %v1120_v55 = vld [vmem:[%s2033_s1 + $0x170] sm:$0xf0]  ;;  %v1119_v57 = vor.u32 %v1402_v51, %v1118_v49  ;;  %v995_v58 = vor.u32 %v1368_v52, %v992_v53  ;;  %v974_v59 = vld [vmem:[%s2033_s1 + $0x40] sm:$0xf]  ;;  %v1366_v60 = vld [vmem:[%s2033_s1 + $0x4c] sm:$0xf0] }
   0xf   :  { %v1102_v61 = vld [vmem:[%s2033_s1 + $0x140] sm:$0xf]  ;;  %v1123_v62 = vor.u32 %v1400_v54, %v1120_v55  ;;  %v1398_v63 = vld [vmem:[%s2033_s1 + $0x14c] sm:$0xf0]  ;;  %v1364_v0 = vld [vmem:[%s2033_s1 + $0x44] sm:$0xf]  ;;  %v975_v4 = vor.u32 %v1366_v60, %v974_v59 }
  0x10   :  { %431 = vmatpush.bf16.msra.mxu0 %v1007_v44  ;;  %v976_v1 = vld [vmem:[%s2033_s1 + $0x50] sm:$0xf0]  ;;  %v1396_v2 = vld [vmem:[%s2033_s1 + $0x144] sm:$0xf]  ;;  %v1103_v5 = vor.u32 %v1398_v63, %v1102_v61  ;;  %v958_v7 = vld [vmem:[%s2033_s1 + $0x20] sm:$0xf] }
  0x11   :  { %444 = vmatpush.bf16.msra.mxu1 %v1135_v45  ;;  %457 = vmatpush.bf16.msra.mxu2 %v1011_v46  ;;  %v1104_v3 = vld [vmem:[%s2033_s1 + $0x150] sm:$0xf0]  ;;  %v979_v6 = vor.u32 %v1364_v0, %v976_v1  ;;  %v1362_v8 = vld [vmem:[%s2033_s1 + $0x2c] sm:$0xf0]  ;;  %v1086_v9 = vld [vmem:[%s2033_s1 + $0x120] sm:$0xf] }
  0x12   :  { %470 = vmatpush.bf16.msra.mxu3 %v1139_v50  ;;  %v1107_v10 = vor.u32 %v1396_v2, %v1104_v3  ;;  %v1394_v11 = vld [vmem:[%s2033_s1 + $0x12c] sm:$0xf0]  ;;  %v1360_v12 = vld [vmem:[%s2033_s1 + $0x24] sm:$0xf]  ;;  %v960_v13 = vld [vmem:[%s2033_s1 + $0x30] sm:$0xf0]  ;;  %v959_v16 = vor.u32 %v1362_v8, %v958_v7 }
  0x13   :  { %v1392_v14 = vld [vmem:[%s2033_s1 + $0x124] sm:$0xf]  ;;  %v1088_v15 = vld [vmem:[%s2033_s1 + $0x130] sm:$0xf0]  ;;  %v942_v17 = vld [vmem:[%s2033_s1] sm:$0xf]  ;;  %v1087_v20 = vor.u32 %v1394_v11, %v1086_v9  ;;  %v963_v21 = vor.u32 %v1360_v12, %v960_v13 }
  0x14   :  { %432 = vmatpush.bf16.msra.mxu0 %v991_v56  ;;  %v1358_v18 = vld [vmem:[%s2033_s1 + $0xc] sm:$0xf0]  ;;  %v1070_v19 = vld [vmem:[%s2033_s1 + $0x100] sm:$0xf]  ;;  %v1356_v23 = vld [vmem:[%s2033_s1 + $0x4] sm:$0xf]  ;;  %v1091_v25 = vor.u32 %v1392_v14, %v1088_v15 }
  0x15   :  { %445 = vmatpush.bf16.msra.mxu1 %v1119_v57  ;;  %458 = vmatpush.bf16.msra.mxu2 %v995_v58  ;;  %v1390_v22 = vld [vmem:[%s2033_s1 + $0x10c] sm:$0xf0]  ;;  %v944_v24 = vld [vmem:[%s2033_s1 + $0x10] sm:$0xf0]  ;;  %v1388_v26 = vld [vmem:[%s2033_s1 + $0x104] sm:$0xf]  ;;  %v943_v32 = vor.u32 %v1358_v18, %v942_v17 }
  0x16   :  { %471 = vmatpush.bf16.msra.mxu3 %v1123_v62  ;;  %v1072_v27 = vld [vmem:[%s2033_s1 + $0x110] sm:$0xf0]  ;;  %v1062_v28 = vld [vmem:[%s2033_s1 + $0xe8] sm:$0xf]  ;;  %v1387_v29 = vld [vmem:[%s2033_s1 + $0xf4] sm:$0xf0]  ;;  %v1071_v37 = vor.u32 %v1390_v22, %v1070_v19  ;;  %v947_v38 = vor.u32 %v1356_v23, %v944_v24 }
  0x17   :  { %v1190_v30 = vld [vmem:[%s2033_s1 + $0x1e8] sm:$0xf]  ;;  %v26_v31 = vld [vmem:[%s2034_s0] sm:$0xff]  ;;  %v1419_v33 = vld [vmem:[%s2033_s1 + $0x1f4] sm:$0xf0]  ;;  %v1075_v42 = vor.u32 %v1388_v26, %v1072_v27  ;;  %v1063_v43 = vor.u32 %v1387_v29, %v1062_v28 }
  0x18   :  { %433 = vmatpush.bf16.msra.mxu0 %v975_v4  ;;  %v1385_v34 = vld [vmem:[%s2033_s1 + $0xec] sm:$0xf]  ;;  %v1064_v35 = vld [vmem:[%s2033_s1 + $0xf8] sm:$0xf0]  ;;  %v102_v36 = vunpack.c.l.b16 %v26_v31  ;;  %v103_v41 = vunpack.c.h.b16 %v26_v31  ;;  %v1191_v44 = vor.u32 %v1419_v33, %v1190_v30  ;;  %v1046_v46 = vld [vmem:[%s2033_s1 + $0xc8] sm:$0xf] }
  0x19   :  { %446 = vmatpush.bf16.msra.mxu1 %v1103_v5  ;;  %459 = vmatpush.bf16.msra.mxu2 %v979_v6  ;;  %v1417_v39 = vld [vmem:[%s2033_s1 + $0x1ec] sm:$0xf]  ;;  %v1192_v40 = vld [vmem:[%s2033_s1 + $0x1f8] sm:$0xf0]  ;;  %v1067_v45 = vor.u32 %v1385_v34, %v1064_v35  ;;  %v1383_v47 = vld [vmem:[%s2033_s1 + $0xd4] sm:$0xf0] }
  0x1a   :  { %472 = vmatpush.bf16.msra.mxu3 %v1107_v10  ;;  %v1174_v48 = vld [vmem:[%s2033_s1 + $0x1c8] sm:$0xf]  ;;  %v1195_v49 = vor.u32 %v1417_v39, %v1192_v40  ;;  %v1415_v50 = vld [vmem:[%s2033_s1 + $0x1d4] sm:$0xf0]  ;;  %v1381_v51 = vld [vmem:[%s2033_s1 + $0xcc] sm:$0xf]  ;;  %v1739_v53 = vpack.c.b16 %v102_v36, %v102_v36  ;;  %v1747_v56 = vpack.c.b16 %v103_v41, %v103_v41  ;;  %v1047_v57 = vor.u32 %v1383_v47, %v1046_v46 }
  0x1b   :  { %v1048_v52 = vld [vmem:[%s2033_s1 + $0xd8] sm:$0xf0]  ;;  %v1413_v54 = vld [vmem:[%s2033_s1 + $0x1cc] sm:$0xf]  ;;  %v1175_v58 = vor.u32 %v1415_v50, %v1174_v48  ;;  %v1030_v60 = vld [vmem:[%s2033_s1 + $0xa8] sm:$0xf] }
  0x1c   :  { %434 = vmatpush.bf16.msra.mxu0 %v959_v16  ;;  %v1176_v55 = vld [vmem:[%s2033_s1 + $0x1d8] sm:$0xf0]  ;;  %v1051_v59 = vor.u32 %v1381_v51, %v1048_v52  ;;  %v1379_v61 = vld [vmem:[%s2033_s1 + $0xb4] sm:$0xf0]  ;;  %v1158_v62 = vld [vmem:[%s2033_s1 + $0x1a8] sm:$0xf] }
  0x1d   :  { %447 = vmatpush.bf16.msra.mxu1 %v1087_v20  ;;  %460 = vmatpush.bf16.msra.mxu2 %v963_v21  ;;  %v1179_v63 = vor.u32 %v1413_v54, %v1176_v55  ;;  %v1411_v0 = vld [vmem:[%s2033_s1 + $0x1b4] sm:$0xf0]  ;;  %v1377_v1 = vld [vmem:[%s2033_s1 + $0xac] sm:$0xf]  ;;  %v1032_v2 = vld [vmem:[%s2033_s1 + $0xb8] sm:$0xf0]  ;;  %v1031_v5 = vor.u32 %v1379_v61, %v1030_v60 }
  0x1e   :  { %473 = vmatpush.bf16.msra.mxu3 %v1091_v25  ;;  %v1409_v3 = vld [vmem:[%s2033_s1 + $0x1ac] sm:$0xf]  ;;  %v1160_v4 = vld [vmem:[%s2033_s1 + $0x1b8] sm:$0xf0]  ;;  %v1159_v6 = vor.u32 %v1411_v0, %v1158_v62  ;;  %v1035_v7 = vor.u32 %v1377_v1, %v1032_v2  ;;  %v1014_v8 = vld [vmem:[%s2033_s1 + $0x88] sm:$0xf] }
  0x1f   :  { %v1375_v9 = vld [vmem:[%s2033_s1 + $0x94] sm:$0xf0]  ;;  %v1142_v10 = vld [vmem:[%s2033_s1 + $0x188] sm:$0xf]  ;;  %v1163_v11 = vor.u32 %v1409_v3, %v1160_v4  ;;  %v1373_v13 = vld [vmem:[%s2033_s1 + $0x8c] sm:$0xf] }
  0x20   :  { %435 = vmatpush.bf16.msra.mxu0 %v943_v32  ;;  %v1407_v12 = vld [vmem:[%s2033_s1 + $0x194] sm:$0xf0]  ;;  %v1016_v14 = vld [vmem:[%s2033_s1 + $0x98] sm:$0xf0]  ;;  %v1405_v15 = vld [vmem:[%s2033_s1 + $0x18c] sm:$0xf]  ;;  %v1015_v17 = vor.u32 %v1375_v9, %v1014_v8 }
  0x21   :  { %448 = vmatpush.bf16.msra.mxu1 %v1071_v37  ;;  %461 = vmatpush.bf16.msra.mxu2 %v947_v38  ;;  %v1144_v16 = vld [vmem:[%s2033_s1 + $0x198] sm:$0xf0]  ;;  %v1143_v18 = vor.u32 %v1407_v12, %v1142_v10  ;;  %v1019_v19 = vor.u32 %v1373_v13, %v1016_v14  ;;  %v998_v20 = vld [vmem:[%s2033_s1 + $0x68] sm:$0xf]  ;;  %v1371_v21 = vld [vmem:[%s2033_s1 + $0x74] sm:$0xf0] }
  0x22   :  { %474 = vmatpush.bf16.msra.mxu3 %v1075_v42  ;;  %v1126_v22 = vld [vmem:[%s2033_s1 + $0x168] sm:$0xf]  ;;  %v1147_v23 = vor.u32 %v1405_v15, %v1144_v16  ;;  %v1403_v24 = vld [vmem:[%s2033_s1 + $0x174] sm:$0xf0]  ;;  %v1369_v25 = vld [vmem:[%s2033_s1 + $0x6c] sm:$0xf]  ;;  %v999_v29 = vor.u32 %v1371_v21, %v998_v20 }
  0x23   :  { %436 = vmatmul.bf16.vlgmr.msra.gmra.mxu0 %v1739_v53  ;;  %v1000_v26 = vld [vmem:[%s2033_s1 + $0x78] sm:$0xf0]  ;;  %v1401_v27 = vld [vmem:[%s2033_s1 + $0x16c] sm:$0xf]  ;;  %v1127_v30 = vor.u32 %v1403_v24, %v1126_v22  ;;  %v982_v32 = vld [vmem:[%s2033_s1 + $0x48] sm:$0xf] }
  0x24   :  { %480 = vmatpush.bf16.msrb.mxu0 %v1063_v43  ;;  %462 = vmatmul.bf16.vlgmr.msra.gmra.mxu2 %v1739_v53  ;;  %v1128_v28 = vld [vmem:[%s2033_s1 + $0x178] sm:$0xf0]  ;;  %v1003_v31 = vor.u32 %v1369_v25, %v1000_v26  ;;  %v1367_v33 = vld [vmem:[%s2033_s1 + $0x54] sm:$0xf0]  ;;  %v1110_v34 = vld [vmem:[%s2033_s1 + $0x148] sm:$0xf] }
  0x25   :  { %493 = vmatpush.bf16.msrb.mxu1 %v1191_v44  ;;  %506 = vmatpush.bf16.msrb.mxu2 %v1067_v45  ;;  %v1131_v35 = vor.u32 %v1401_v27, %v1128_v28  ;;  %v1399_v36 = vld [vmem:[%s2033_s1 + $0x154] sm:$0xf0]  ;;  %v1365_v37 = vld [vmem:[%s2033_s1 + $0x4c] sm:$0xf]  ;;  %v984_v38 = vld [vmem:[%s2033_s1 + $0x58] sm:$0xf0]  ;;  %v983_v41 = vor.u32 %v1367_v33, %v982_v32 }
  0x26   :  { %519 = vmatpush.bf16.msrb.mxu3 %v1195_v49  ;;  %449 = vmatmul.bf16.vlgmr.msra.gmra.mxu1 %v1747_v56  ;;  %v1397_v39 = vld [vmem:[%s2033_s1 + $0x14c] sm:$0xf]  ;;  %v1112_v40 = vld [vmem:[%s2033_s1 + $0x158] sm:$0xf0]  ;;  %v1111_v42 = vor.u32 %v1399_v36, %v1110_v34  ;;  %v987_v43 = vor.u32 %v1365_v37, %v984_v38  ;;  %v966_v44 = vld [vmem:[%s2033_s1 + $0x28] sm:$0xf] }
  0x27   :  { %475 = vmatmul.bf16.vlgmr.msra.gmra.mxu3 %v1747_v56  ;;  %v1363_v45 = vld [vmem:[%s2033_s1 + $0x34] sm:$0xf0]  ;;  %v1094_v46 = vld [vmem:[%s2033_s1 + $0x128] sm:$0xf]  ;;  %v1115_v47 = vor.u32 %v1397_v39, %v1112_v40  ;;  %v1361_v49 = vld [vmem:[%s2033_s1 + $0x2c] sm:$0xf] }
  0x28   :  { %481 = vmatpush.bf16.msrb.mxu0 %v1047_v57  ;;  %v1395_v48 = vld [vmem:[%s2033_s1 + $0x134] sm:$0xf0]  ;;  %v968_v50 = vld [vmem:[%s2033_s1 + $0x38] sm:$0xf0]  ;;  %v1393_v51 = vld [vmem:[%s2033_s1 + $0x12c] sm:$0xf]  ;;  %v967_v54 = vor.u32 %v1363_v45, %v966_v44 }
  0x29   :  { %494 = vmatpush.bf16.msrb.mxu1 %v1175_v58  ;;  %507 = vmatpush.bf16.msrb.mxu2 %v1051_v59  ;;  %v1096_v52 = vld [vmem:[%s2033_s1 + $0x138] sm:$0xf0]  ;;  %v1095_v55 = vor.u32 %v1395_v48, %v1094_v46  ;;  %v971_v57 = vor.u32 %v1361_v49, %v968_v50  ;;  %v950_v58 = vld [vmem:[%s2033_s1 + $0x8] sm:$0xf]  ;;  %v1359_v59 = vld [vmem:[%s2033_s1 + $0x14] sm:$0xf0] }
  0x2a   :  { %520 = vmatpush.bf16.msrb.mxu3 %v1179_v63  ;;  %v1078_v60 = vld [vmem:[%s2033_s1 + $0x108] sm:$0xf]  ;;  %v1099_v61 = vor.u32 %v1393_v51, %v1096_v52  ;;  %v1391_v62 = vld [vmem:[%s2033_s1 + $0x114] sm:$0xf0]  ;;  %v1357_v63 = vld [vmem:[%s2033_s1 + $0xc] sm:$0xf]  ;;  %v951_v3 = vor.u32 %v1359_v59, %v950_v58 }
  0x2b   :  { %v952_v0 = vld [vmem:[%s2033_s1 + $0x18] sm:$0xf0]  ;;  %v1389_v1 = vld [vmem:[%s2033_s1 + $0x10c] sm:$0xf]  ;;  %v1079_v4 = vor.u32 %v1391_v62, %v1078_v60  ;;  %v1426_v10 = vld [vmem:[%s2035_s3 + $0x30] sm:$0xff] }
  0x2c   :  { %482 = vmatpush.bf16.msrb.mxu0 %v1031_v5  ;;  %v1080_v2 = vld [vmem:[%s2033_s1 + $0x118] sm:$0xf0]  ;;  %v955_v5 = vor.u32 %v1357_v63, %v952_v0  ;;  %v1425_v12 = vld [vmem:[%s2035_s3 + $0x28] sm:$0xff]  ;;  %v1424_v14 = vld [vmem:[%s2035_s3 + $0x20] sm:$0xff] }
  0x2d   :  { %495 = vmatpush.bf16.msrb.mxu1 %v1159_v6  ;;  %508 = vmatpush.bf16.msrb.mxu2 %v1035_v7  ;;  %v1083_v6 = vor.u32 %v1389_v1, %v1080_v2  ;;  %v1427_v7 = vld [vmem:[%s2035_s3 + $0x38] sm:$0xff]  ;;  %v1433_v13 = vld [vmem:[%s2035_s3 + $0x68] sm:$0xff]  ;;  %v1422_v16 = vld [vmem:[%s2035_s3 + $0x10] sm:$0xff] }
  0x2e   :  { %521 = vmatpush.bf16.msrb.mxu3 %v1163_v11  ;;  %v1435_v8 = vld [vmem:[%s2035_s3 + $0x78] sm:$0xff]  ;;  %v1434_v11 = vld [vmem:[%s2035_s3 + $0x70] sm:$0xff]  ;;  %v1429_v20 = vld [vmem:[%s2035_s3 + $0x48] sm:$0xff] }
  0x2f   :  { %v1443_v9 = vld [vmem:[%s2035_s3 + $0xb8] sm:$0xff]  ;;  %v1420_v22 = vld [vmem:[%s2035_s3] sm:$0xff]  ;;  %v1450_v25 = vld [vmem:[%s2035_s3 + $0xf0] sm:$0xff] }
  0x30   :  { %483 = vmatpush.bf16.msrb.mxu0 %v1015_v17  ;;  %v1431_v15 = vld [vmem:[%s2035_s3 + $0x58] sm:$0xff]  ;;  %v1430_v17 = vld [vmem:[%s2035_s3 + $0x50] sm:$0xff]  ;;  %v1428_v24 = vld [vmem:[%s2035_s3 + $0x40] sm:$0xff] }
  0x31   :  { %496 = vmatpush.bf16.msrb.mxu1 %v1143_v18  ;;  %509 = vmatpush.bf16.msrb.mxu2 %v1019_v19  ;;  %v1421_v18 = vld [vmem:[%s2035_s3 + $0x8] sm:$0xff]  ;;  %v1442_v19 = vld [vmem:[%s2035_s3 + $0xb0] sm:$0xff]  ;;  %v1451_v21 = vld [vmem:[%s2035_s3 + $0xf8] sm:$0xff] }
  0x32   :  { %522 = vmatpush.bf16.msrb.mxu3 %v1147_v23  ;;  %v1441_v23 = vld [vmem:[%s2035_s3 + $0xa8] sm:$0xff]  ;;  %v1440_v26 = vld [vmem:[%s2035_s3 + $0xa0] sm:$0xff]  ;;  %v1439_v28 = vld [vmem:[%s2035_s3 + $0x98] sm:$0xff] }
  0x33   :  { %v1449_v27 = vld [vmem:[%s2035_s3 + $0xe8] sm:$0xff]  ;;  %v1447_v32 = vld [vmem:[%s2035_s3 + $0xd8] sm:$0xff]  ;;  %v1446_v36 = vld [vmem:[%s2035_s3 + $0xd0] sm:$0xff] }
  0x34   :  { %484 = vmatpush.bf16.msrb.mxu0 %v999_v29  ;;  %v1448_v29 = vld [vmem:[%s2035_s3 + $0xe0] sm:$0xff]  ;;  %v1437_v34 = vld [vmem:[%s2035_s3 + $0x88] sm:$0xff] }
  0x35   :  { %497 = vmatpush.bf16.msrb.mxu1 %v1127_v30  ;;  %510 = vmatpush.bf16.msrb.mxu2 %v1003_v31  ;;  %v1438_v30 = vld [vmem:[%s2035_s3 + $0x90] sm:$0xff]  ;;  %v91_v31 = vld [vmem:[%s2037_s2] sm:$0xf] }
  0x36   :  { %523 = vmatpush.bf16.msrb.mxu3 %v1131_v35  ;;  %v93_v33 = vperm.slane %v91_v31, 0  ;;  %v94_v39 = vperm.slane %v91_v31, 1  ;;  %v1436_v40 = vld [vmem:[%s2035_s3 + $0x80] sm:$0xff]  ;;  %v95_v58 = vperm.slane %v91_v31, 2  ;;  %v96_v63 = vperm.slane %v91_v31, 3 }
  0x37   :  { %v1444_v50 = vld [vmem:[%s2035_s3 + $0xc0] sm:$0xff] }
  0x38   :  { %485 = vmatpush.bf16.msrb.mxu0 %v983_v41 }
  0x39   :  { %498 = vmatpush.bf16.msrb.mxu1 %v1111_v42  ;;  %511 = vmatpush.bf16.msrb.mxu2 %v987_v43  ;;  %v1445_v42 = vld [vmem:[%s2035_s3 + $0xc8] sm:$0xff] }
  0x3a   :  { %524 = vmatpush.bf16.msrb.mxu3 %v1115_v47 }
  0x3c   :  { %486 = vmatpush.bf16.msrb.mxu0 %v967_v54 }
  0x3d   :  { %499 = vmatpush.bf16.msrb.mxu1 %v1095_v55  ;;  %512 = vmatpush.bf16.msrb.mxu2 %v971_v57 }
  0x3e   :  { %525 = vmatpush.bf16.msrb.mxu3 %v1099_v61 }
  0x40   :  { %487 = vmatpush.bf16.msrb.mxu0 %v951_v3 }
  0x41   :  { %500 = vmatpush.bf16.msrb.mxu1 %v1079_v4  ;;  %513 = vmatpush.bf16.msrb.mxu2 %v955_v5 }
  0x42   :  { %526 = vmatpush.bf16.msrb.mxu3 %v1083_v6 }
  0x43   :  { %488 = vmatmul.bf16.vlgmr.msrb.gmra.mxu0 %v1739_v53 }
  0x44   :  { %800 = vmatpush.bf16.msra.mxu0 %v1427_v7  ;;  %501 = vmatmul.bf16.vlgmr.msrb.gmra.mxu1 %v1747_v56 }
  0x45   :  { %813 = vmatpush.bf16.msra.mxu1 %v1435_v8  ;;  %514 = vmatmul.bf16.vlgmr.msrb.gmra.mxu2 %v1739_v53  ;;  %v1432_v53 = vld [vmem:[%s2035_s3 + $0x60] sm:$0xff] }
  0x46   :  { %527 = vmatmul.bf16.vlgmr.msrb.gmra.mxu3 %v1747_v56  ;;  %826 = vmatpush.bf16.msra.mxu2 %v1443_v9  ;;  %v1423_v56 = vld [vmem:[%s2035_s3 + $0x18] sm:$0xff] }
  0x47   :  { %839 = vmatpush.bf16.msra.mxu3 %v1451_v21 }
  0x48   :  { %801 = vmatpush.bf16.msra.mxu0 %v1426_v10 }
  0x49   :  { %814 = vmatpush.bf16.msra.mxu1 %v1434_v11 }
  0x4a   :  { %827 = vmatpush.bf16.msra.mxu2 %v1442_v19  ;;  %v1453_v19 = vld [vmem:[%s2039_s5 + $0x8] sm:$0xff] }
  0x4b   :  { %840 = vmatpush.bf16.msra.mxu3 %v1450_v25 }
  0x4c   :  { %802 = vmatpush.bf16.msra.mxu0 %v1425_v12  ;;  %v1459_v12 = vld [vmem:[%s2039_s5 + $0x38] sm:$0xff] }
  0x4d   :  { %815 = vmatpush.bf16.msra.mxu1 %v1433_v13  ;;  %v1458_v13 = vld [vmem:[%s2039_s5 + $0x30] sm:$0xff] }
  0x4e   :  { %828 = vmatpush.bf16.msra.mxu2 %v1441_v23 }
  0x4f   :  { %841 = vmatpush.bf16.msra.mxu3 %v1449_v27 }
  0x50   :  { %803 = vmatpush.bf16.msra.mxu0 %v1424_v14  ;;  %v1457_v14 = vld [vmem:[%s2039_s5 + $0x28] sm:$0xff] }
  0x51   :  { %816 = vmatpush.bf16.msra.mxu1 %v1432_v53  ;;  %v1456_v53 = vld [vmem:[%s2039_s5 + $0x20] sm:$0xff] }
  0x52   :  { %829 = vmatpush.bf16.msra.mxu2 %v1440_v26 }
  0x53   :  { %842 = vmatpush.bf16.msra.mxu3 %v1448_v29 }
  0x54   :  { %804 = vmatpush.bf16.msra.mxu0 %v1423_v56  ;;  %v1455_v56 = vld [vmem:[%s2039_s5 + $0x18] sm:$0xff] }
  0x55   :  { %817 = vmatpush.bf16.msra.mxu1 %v1431_v15 }
  0x56   :  { %830 = vmatpush.bf16.msra.mxu2 %v1439_v28 }
  0x57   :  { %843 = vmatpush.bf16.msra.mxu3 %v1447_v32 }
  0x58   :  { %805 = vmatpush.bf16.msra.mxu0 %v1422_v16  ;;  %v1454_v16 = vld [vmem:[%s2039_s5 + $0x10] sm:$0xff] }
  0x59   :  { %818 = vmatpush.bf16.msra.mxu1 %v1430_v17 }
  0x5a   :  { %831 = vmatpush.bf16.msra.mxu2 %v1438_v30 }
  0x5b   :  { %844 = vmatpush.bf16.msra.mxu3 %v1446_v36 }
  0x5c   :  { %806 = vmatpush.bf16.msra.mxu0 %v1421_v18 }
  0x5d   :  { %819 = vmatpush.bf16.msra.mxu1 %v1429_v20  ;;  %v1452_v20 = vld [vmem:[%s2039_s5] sm:$0xff] }
  0x5e   :  { %832 = vmatpush.bf16.msra.mxu2 %v1437_v34 }
  0x5f   :  { %845 = vmatpush.bf16.msra.mxu3 %v1445_v42 }
  0x60   :  { %807 = vmatpush.bf16.msra.mxu0 %v1420_v22  ;;  %v1460_v22 = vld [vmem:[%s2036_s4] ss:$0 sm:$0xff] }
  0x61   :  { %820 = vmatpush.bf16.msra.mxu1 %v1428_v24 }
  0x62   :  { %833 = vmatpush.bf16.msra.mxu2 %v1436_v40 }
  0x63   :  { %846 = vmatpush.bf16.msra.mxu3 %v1444_v50 }
  0x64   :  { %922 = vmatpush.bf16.msrb.mxu0 %v1459_v12 }
  0x68   :  { %923 = vmatpush.bf16.msrb.mxu0 %v1458_v13 }
  0x6c   :  { %924 = vmatpush.bf16.msrb.mxu0 %v1457_v14 }
  0x70   :  { %925 = vmatpush.bf16.msrb.mxu0 %v1456_v53 }
  0x74   :  { %926 = vmatpush.bf16.msrb.mxu0 %v1455_v56 }
  0x78   :  { %927 = vmatpush.bf16.msrb.mxu0 %v1454_v16 }
  0x7c   :  { %928 = vmatpush.bf16.msrb.mxu0 %v1453_v19 }
  0x80   :  { %929 = vmatpush.bf16.msrb.mxu0 %v1452_v20 }
  0xa0   :  { %v437_v35 = vpop.f32.mrf.mxu0 }
  0xa1   :  { %v438_v37 = vadd.f32 %v437_v35, %v93_v33  ;;  %v1461_v33 = vld [vmem:[%s2038_s6] ss:$0 sm:$0xff] }
  0xa3   :  { %v450_v38 = vpop.f32.mrf.mxu1 }
  0xa4   :  { %v451_v41 = vadd.f32 %v450_v38, %v438_v37 }
  0xa6   :  { %v532_v43 = vmax.f32 %v451_v41, 0.0 }
  0xa7   :  { %v463_v44 = vpop.f32.mrf.mxu2 }
  0xa8   :  { %v464_v45 = vadd.f32 %v463_v44, %v94_v39  ;;  %v536_v47 = vpack.c.bf16 %v532_v43, %v532_v43  ;;  %v439_v49 = vpop.f32.mrf.mxu0 }
  0xaa   :  { %v476_v46 = vpop.f32.mrf.mxu3  ;;  %808 = vmatmul.bf16.vlgmr.msra.gmra.mxu0 %v536_v47 }
  0xab   :  { %v477_v48 = vadd.f32 %v476_v46, %v464_v45  ;;  %v452_v51 = vpop.f32.mrf.mxu1 }
  0xad   :  { %v533_v52 = vmax.f32 %v477_v48, 0.0 }
  0xaf   :  { %v537_v54 = vpack.c.bf16 %v533_v52, %v533_v52  ;;  %v465_v55 = vpop.f32.mrf.mxu2 }
  0xb1   :  { %821 = vmatmul.bf16.vlgmr.msra.gmra.mxu1 %v537_v54 }
  0xb2   :  { %v478_v57 = vpop.f32.mrf.mxu3 }
  0xc0   :  { %v489_v59 = vpop.f32.mrf.mxu0 }
  0xc1   :  { %v490_v60 = vadd.f32 %v489_v59, %v95_v58  ;;  %v502_v61 = vpop.f32.mrf.mxu1 }
  0xc3   :  { %v503_v62 = vadd.f32 %v502_v61, %v490_v60 }
  0xc5   :  { %v534_v0 = vmax.f32 %v503_v62, 0.0 }
  0xc7   :  { %v538_v1 = vpack.c.bf16 %v534_v0, %v534_v0 }
  0xc8   :  { %v515_v2 = vpop.f32.mrf.mxu2  ;;  %v491_v5 = vpop.f32.mrf.mxu0 }
  0xc9   :  { %v516_v3 = vadd.f32 %v515_v2, %v96_v63  ;;  %v528_v4 = vpop.f32.mrf.mxu3  ;;  %v504_v6 = vpop.f32.mrf.mxu1  ;;  %834 = vmatmul.bf16.vlgmr.msra.gmra.mxu2 %v538_v1 }
  0xcb   :  { %v529_v7 = vadd.f32 %v528_v4, %v516_v3 }
  0xcd   :  { %v535_v8 = vmax.f32 %v529_v7, 0.0 }
  0xcf   :  { %v539_v9 = vpack.c.bf16 %v535_v8, %v535_v8 }
  0xd0   :  { %v517_v10 = vpop.f32.mrf.mxu2 }
  0xd1   :  { %v530_v11 = vpop.f32.mrf.mxu3  ;;  %847 = vmatmul.bf16.vlgmr.msra.gmra.mxu3 %v539_v9 }
 0x127   :  { %v809_v15 = vpop.f32.mrf.mxu0 }
 0x128   :  { %v810_v23 = vadd.f32 %v1460_v22, %v809_v15 }
 0x12e   :  { %v822_v17 = vpop.f32.mrf.mxu1 }
 0x12f   :  { %v811_v18 = vpop.f32.mrf.mxu0  ;;  %v823_v25 = vadd.f32 %v822_v17, %v810_v23 }
 0x136   :  { %v824_v21 = vpop.f32.mrf.mxu1 }
 0x14c   :  { %v835_v24 = vpop.f32.mrf.mxu2 }
 0x14d   :  { %v836_v26 = vadd.f32 %v835_v24, %v823_v25 }
 0x154   :  { %v848_v27 = vpop.f32.mrf.mxu3  ;;  %v837_v29 = vpop.f32.mrf.mxu2 }
 0x155   :  { %v849_v28 = vadd.f32 %v848_v27, %v836_v26 }
 0x157   :  { %v852_v30 = vmax.f32 %v849_v28, 0.0 }
 0x159   :  { %v853_v31 = vpack.c.bf16 %v852_v30, %v852_v30 }
 0x15b   :  { %930 = vmatmul.bf16.vlgmr.msrb.gmra.mxu0 %v853_v31 }
 0x15c   :  { %v850_v32 = vpop.f32.mrf.mxu3 }
 0x1d8   :  { %v931_v34 = vpop.f32.mrf.mxu0 }
 0x1d9   :  { %v932_v35 = vadd.f32 %v1461_v33, %v931_v34 }
 0x1db   :  { %935 = vst [vmem:[%s2040_s7] sm:$0xff] %v932_v35 }
 0x1e0   :  { %v933_v36 = vpop.f32.mrf.mxu0 }

</bundles_post_ra>
